<compile_context>
chip_gen: v7x
topology: tpu7x:2x2x1
jax: 0.10.0
libtpu: 0.0.40
codegen_flags: <defaults>
</compile_context>

<pallas_src>
import functools

import jax
import jax.numpy as jnp
from jax.experimental import pallas as pl
from jax.experimental.pallas import tpu as pltpu


def _round_up(v, m):
    return (v + m - 1) // m * m


def _vmem_capacity_bytes():
    try:
        info = pltpu.get_tpu_info()
        return int(getattr(info, "vmem_capacity_bytes", 128 * 1024 * 1024))
    except Exception:
        return 128 * 1024 * 1024


def _device_caps():
    vmem = _vmem_capacity_bytes()
    if vmem >= 128 * 1024 * 1024:
        # v5e / v6e: 128 MiB VMEM -> bigger tiles, generous scoped limit.
        return dict(tm_cap=512, tn_cap=1024, tk_cap=2048,
                    vmem_limit=96 * 1024 * 1024, small_vmem=False)
    # v7x: 64 MiB VMEM (32 MiB scoped default), 2 TensorCores.
    return dict(tm_cap=512, tn_cap=512, tk_cap=1024,
                vmem_limit=40 * 1024 * 1024, small_vmem=True)


def _nk_plan(in_dim, out_dim, caps):
    """N/K tile sizes and padded dims — a pure function of (F, O, caps) so the
    one-time param prep and the per-call wrapper always agree."""
    tn = min(_round_up(out_dim, 128), caps["tn_cap"])
    tk = min(_round_up(in_dim, 128), caps["tk_cap"])
    # v7x megacore: if the whole output width fits one tile, split N so the
    # "parallel" axis has >= 2 blocks and the second TensorCore isn't idle.
    if caps["small_vmem"] and out_dim <= tn and tn >= 256 and tn % 256 == 0:
        tn //= 2
    return tn, tk, _round_up(out_dim, tn), _round_up(in_dim, tk)


def prepare_logistic_params(weight, bias, *, caps=None):
    """One-time parameter setup — call OUTSIDE the per-step path.

    weight: [out_dim, in_dim] (PyTorch nn.Linear layout), bias: [out_dim].
    Returns (w_t [Fp, Op], b2 [1, Op]): weight transposed to [in_dim, out_dim]
    and both zero-padded to the tile-aligned shapes `logistic_forward` expects.
    """
    caps = caps or _device_caps()
    out_dim, in_dim = weight.shape
    tn, tk, Op, Fp = _nk_plan(in_dim, out_dim, caps)
    del tn, tk
    w_t = jnp.asarray(weight).T                       # [in_dim, out_dim]
    if (Fp, Op) != (in_dim, out_dim):
        w_t = jnp.pad(w_t, ((0, Fp - in_dim), (0, Op - out_dim)))
    b2 = jnp.asarray(bias).reshape(1, out_dim)
    if Op != out_dim:
        b2 = jnp.pad(b2, ((0, 0), (0, Op - out_dim)))
    return w_t, b2


def _logistic_kernel_fused(x_ref, w_ref, b_ref, o_ref, *, approx):
    """Single K block: dot + bias + sigmoid straight to the output tile."""
    z = jnp.dot(x_ref[...], w_ref[...], preferred_element_type=jnp.float32)
    z = z + b_ref[...].astype(jnp.float32)
    # sigmoid(z) = 1 / (1 + exp(-z)): exp -> EUP, reciprocal -> EUP (vrcp when
    # approx), keeping the epilogue off the VALU slots.
    o_ref[...] = pl.reciprocal(1.0 + jnp.exp(-z), approx=approx).astype(o_ref.dtype)


def _logistic_kernel_tiled(x_ref, w_ref, b_ref, o_ref, acc_ref, *, approx):
    """K-tiled path: f32 VMEM accumulator, bias folded into the k==0 init."""
    k = pl.program_id(2)

    @pl.when(k == 0)
    def _init():
        acc_ref[...] = jnp.broadcast_to(b_ref[...].astype(jnp.float32),
                                        acc_ref.shape)

    acc_ref[...] += jnp.dot(x_ref[...], w_ref[...],
                            preferred_element_type=jnp.float32)

    @pl.when(k == pl.num_programs(2) - 1)
    def _final():
        o_ref[...] = pl.reciprocal(1.0 + jnp.exp(-acc_ref[...]),
                                   approx=approx).astype(o_ref.dtype)


def logistic_forward(x, w_t, b2, out_dim, *, caps=None):
    """sigmoid(x.view(B,-1) @ W.T + b) using pre-transposed / pre-padded params.

    x:   [B, ...]   (flattened to [B, in_dim])
    w_t: [Fp, Op]   from prepare_logistic_params
    b2:  [1, Op]    from prepare_logistic_params
    returns [B, out_dim] in x.dtype (f32 accumulation inside the kernel).
    """
    caps = caps or _device_caps()
    B = x.shape[0]
    x2 = x.reshape(B, -1)                              # row-major flatten: free
    F = x2.shape[1]

    tn, tk, Op, Fp = _nk_plan(F, out_dim, caps)
    assert w_t.shape == (Fp, Op), (w_t.shape, (Fp, Op))
    assert b2.shape == (1, Op), (b2.shape, (1, Op))

    # M tile rounded to the dtype's sublane packing (8 f32 / 16 bf16 / 32 int8).
    pack = {4: 8, 2: 16, 1: 32}.get(jnp.dtype(x2.dtype).itemsize, 8)
    tm = min(_round_up(B, pack), caps["tm_cap"])
    Bp = _round_up(B, tm)

    if (Bp, Fp) != (B, F):
        # K-tail contributions vanish against the zero-padded weight rows;
        # extra M rows are sliced off below.  Only the (small) activation is
        # padded per call.
        x2 = jnp.pad(x2, ((0, Bp - B), (0, Fp - F)))

    gi, gj, gk = Bp // tm, Op // tn, Fp // tk
    out_dtype = x.dtype
    approx = jnp.dtype(out_dtype).itemsize < 4   # approx vrcp only for <=16-bit

    bytes_accessed = (x2.size * x2.dtype.itemsize
                      + w_t.size * w_t.dtype.itemsize
                      + b2.size * b2.dtype.itemsize
                      + Bp * Op * jnp.dtype(out_dtype).itemsize)
    cost = pl.CostEstimate(flops=2 * Bp * Fp * Op,
                           transcendentals=Bp * Op,
                           bytes_accessed=bytes_accessed)

    if gk == 1:
        # Common case (F <= tk): no K grid axis, no accumulator scratch.
        grid_spec = pltpu.PrefetchScalarGridSpec(
            num_scalar_prefetch=0,
            grid=(gi, gj),
            in_specs=[
                pl.BlockSpec((tm, tk), lambda i, j: (i, 0)),   # x tile
                pl.BlockSpec((tk, tn), lambda i, j: (0, j)),   # W.T tile [F,O]
                pl.BlockSpec((1, tn), lambda i, j: (0, j)),    # bias tile
            ],
            out_specs=pl.BlockSpec((tm, tn), lambda i, j: (i, j)),
        )
        kernel = functools.partial(_logistic_kernel_fused, approx=approx)
        semantics = ("parallel", "parallel")
    else:
        # Deeper buffering on the streamed operands only on small-VMEM (v7x)
        # parts with enough K steps to hide the extra DMA issue latency.
        buffered = caps["small_vmem"] and gk >= 3

        def _stream_spec(shape, imap):
            if buffered:
                return pl.BlockSpec(shape, imap, pipeline_mode=pl.Buffered(3))
            return pl.BlockSpec(shape, imap)

        grid_spec = pltpu.PrefetchScalarGridSpec(
            num_scalar_prefetch=0,
            grid=(gi, gj, gk),
            in_specs=[
                _stream_spec((tm, tk), lambda i, j, k: (i, k)),  # x tile
                _stream_spec((tk, tn), lambda i, j, k: (k, j)),  # W.T tile
                pl.BlockSpec((1, tn), lambda i, j, k: (0, j)),   # bias tile
            ],
            out_specs=pl.BlockSpec((tm, tn), lambda i, j, k: (i, j)),
            scratch_shapes=[pltpu.VMEM((tm, tn), jnp.float32)],
        )
        kernel = functools.partial(_logistic_kernel_tiled, approx=approx)
        semantics = ("parallel", "parallel", "arbitrary")

    out = pl.pallas_call(
        kernel,
        out_shape=jax.ShapeDtypeStruct((Bp, Op), out_dtype),
        grid_spec=grid_spec,
        compiler_params=pltpu.CompilerParams(
            dimension_semantics=semantics,
            vmem_limit_bytes=caps["vmem_limit"],
        ),
        cost_estimate=cost,
    )(x2, w_t, b2)

    if (Bp, Op) != (B, out_dim):
        out = out[:B, :out_dim]
    return out


if __name__ == "__main__":
    key = jax.random.PRNGKey(0)
    kx, kw, kb = jax.random.split(key, 3)

    # Logistic(in_dim, out_dim) on x.view(B, -1):
    # x [B, C, H, W] = [16, 4, 8, 8] -> in_dim = 256, out_dim = 128.
    B, C, H, W = 16, 4, 8, 8
    in_dim = C * H * W
    out_dim = 128

    bound = 1.0 / (in_dim ** 0.5)
    x = jax.random.normal(kx, (B, C, H, W), dtype=jnp.float32).astype(jnp.bfloat16)
    weight = jax.random.uniform(kw, (out_dim, in_dim), jnp.float32,
                                -bound, bound).astype(jnp.bfloat16)
    bias = jax.random.uniform(kb, (out_dim,), jnp.float32,
                              -bound, bound).astype(jnp.bfloat16)

    # One-time parameter setup (transpose + pad) — NOT in the per-step path.
    w_t, b2 = prepare_logistic_params(weight, bias)

    fwd = jax.jit(logistic_forward, static_argnums=(3,))
    out = jax.block_until_ready(fwd(x, w_t, b2, out_dim))

    # Reference in f32 on the same bf16-valued operands.
    x32 = x.reshape(B, -1).astype(jnp.float32)
    ref = jax.nn.sigmoid(x32 @ weight.astype(jnp.float32).T
                         + bias.astype(jnp.float32))
    assert out.shape == (B, out_dim), out.shape
    assert out.dtype == x.dtype
    err = jnp.max(jnp.abs(out.astype(jnp.float32) - ref))
    assert err < 1e-2, err   # bf16 output rounding + approx reciprocal

    # float32 path exercises the exact (non-approx) sigmoid epilogue.
    xf = x.astype(jnp.float32)
    wf = weight.astype(jnp.float32)
    bf = bias.astype(jnp.float32)
    w_tf, b2f = prepare_logistic_params(wf, bf)
    outf = jax.block_until_ready(
        jax.jit(logistic_forward, static_argnums=(3,))(xf, w_tf, b2f, out_dim))
    errf = jnp.max(jnp.abs(outf - jax.nn.sigmoid(x32 @ wf.T + bf)))
    assert outf.dtype == jnp.float32
    assert errf < 2e-3, errf   # MXU f32 matmul at default precision

    print("KERNEL_OK")
</pallas_src>

<mosaic_0001>
module attributes {stable_mosaic.version = 11 : i64} {
  func.func @_logistic_kernel_fused(%arg0: i32, %arg1: i32, %arg2: memref<16x256xbf16, #tpu.memory_space<vmem>>, %arg3: memref<256x128xbf16, #tpu.memory_space<vmem>>, %arg4: memref<1x128xbf16, #tpu.memory_space<vmem>>, %arg5: memref<16x128xbf16, #tpu.memory_space<vmem>>) attributes {dimension_semantics = [#tpu.dimension_semantics<parallel>, #tpu.dimension_semantics<parallel>], iteration_bounds = array<i64: 1, 1>, scalar_prefetch = 0 : i64, scratch_operands = 0 : i64, tpu.core_type = #tpu.core_type<tc>, window_params = [{transform_indices = @transform_0, window_bounds = array<i64: 16, 256>}, {transform_indices = @transform_1, window_bounds = array<i64: 256, 128>}, {transform_indices = @transform_2, window_bounds = array<i64: 1, 128>}, {transform_indices = @transform_3, window_bounds = array<i64: 16, 128>}]} {
    %c0 = arith.constant 0 : index
    %c0_0 = arith.constant 0 : index
    %0 = vector.load %arg2[%c0, %c0_0] : memref<16x256xbf16, #tpu.memory_space<vmem>>, vector<16x256xbf16>
    %c0_1 = arith.constant 0 : index
    %c0_2 = arith.constant 0 : index
    %1 = vector.load %arg3[%c0_1, %c0_2] : memref<256x128xbf16, #tpu.memory_space<vmem>>, vector<256x128xbf16>
    %cst = arith.constant dense<0.000000e+00> : vector<16x128xf32>
    %2 = tpu.matmul %0, %1, %cst {dimension_numbers = #tpu.dot_dimension_numbers<[1], [0], [0], [1], [0, 0, 1, 1], [], []>} : vector<16x256xbf16>, vector<256x128xbf16>, vector<16x128xf32> -> vector<16x128xf32>
    %c0_3 = arith.constant 0 : index
    %c0_4 = arith.constant 0 : index
    %3 = vector.load %arg4[%c0_3, %c0_4] : memref<1x128xbf16, #tpu.memory_space<vmem>>, vector<1x128xbf16>
    %4 = arith.extf %3 : vector<1x128xbf16> to vector<1x128xf32>
    %5 = vector.broadcast %4 : vector<1x128xf32> to vector<16x128xf32>
    %6 = arith.addf %2, %5 : vector<16x128xf32>
    %cst_5 = arith.constant 0.000000e+00 : f32
    %7 = vector.broadcast %cst_5 : f32 to vector<16x128xf32>
    %8 = arith.subf %7, %6 : vector<16x128xf32>
    %9 = math.exp %8 : vector<16x128xf32>
    %cst_6 = arith.constant 1.000000e+00 : f32
    %10 = vector.broadcast %cst_6 : f32 to vector<16x128xf32>
    %11 = arith.addf %10, %9 : vector<16x128xf32>
    %12 = tpu.reciprocal %11 {approx = true} : vector<16x128xf32> -> vector<16x128xf32>
    %13 = arith.truncf %12 : vector<16x128xf32> to vector<16x128xbf16>
    %c0_7 = arith.constant 0 : index
    %c0_8 = arith.constant 0 : index
    %14 = vector.load %arg5[%c0_7, %c0_8] : memref<16x128xbf16, #tpu.memory_space<vmem>>, vector<16x128xbf16>
    tpu.vector_store %arg5[%c0_7, %c0_8], %13 {strides = array<i32>} : memref<16x128xbf16, #tpu.memory_space<vmem>>, vector<16x128xbf16>,
    return
  }
  func.func @transform_0(%arg0: i32, %arg1: i32) -> (i32, i32) {
    %c0_i32 = arith.constant 0 : i32
    %c0_i32_0 = arith.constant 0 : i32
    return %arg0, %c0_i32 : i32, i32
  }
  func.func @transform_1(%arg0: i32, %arg1: i32) -> (i32, i32) {
    %c0_i32 = arith.constant 0 : i32
    %c0_i32_0 = arith.constant 0 : i32
    return %c0_i32, %arg1 : i32, i32
  }
  func.func @transform_2(%arg0: i32, %arg1: i32) -> (i32, i32) {
    %c0_i32 = arith.constant 0 : i32
    %c0_i32_0 = arith.constant 0 : i32
    return %c0_i32, %arg1 : i32, i32
  }
  func.func @transform_3(%arg0: i32, %arg1: i32) -> (i32, i32) {
    %c0_i32 = arith.constant 0 : i32
    return %arg0, %arg1 : i32, i32
  }
}

</mosaic_0001>

<bundles_post_ra>
// kernel: logistic_forward.1
= control target key start
LH: loop header
LB: loop body
LE: loop exit
PB: predicated region body
PF: predicated region fallthrough
CT: control target
= control target key end

     0   :  { %8 = vsyncpa [#allocation3], 0  ;;  %s540_s0 = inlined_call_operand.hbm [shape: bf16[16,256], index: 0, kind: input, shape index: {}]   ;;  %s541_s1 = inlined_call_operand.hbm [shape: bf16[256,128], index: 1, kind: input, shape index: {}]   ;;  %s542_s2 = inlined_call_operand.hbm [shape: bf16[1,128], index: 2, kind: input, shape index: {}]   ;;  %s543_s3 = inlined_call_operand.hbm [shape: bf16[16,128], index: 3, kind: output, shape index: {}]  }
   0x1   :  { %9 = vsyncpa [#allocation6], 0 }
   0x2   :  { %10 = vsyncpa [#allocation4], 0  ;;  %s458_s12 = smov [#allocation5]   ;;  %s364_s16 = scalar_lea.hbm %s541_s1, 2048 }
   0x3   :  { %s28_s13 = sshll.u32 %s458_s12, 4  ;;  %p365_p0 = scmp.ne.s32.totalorder %s541_s1, %s364_s16  ;;  %s29_s13 = int_to_ptr.vmem [resolvable:$true] %s28_s13 }
   0x4   :  { %p368_p1 = scmp.lt.u32.totalorder %s364_s16, %s541_s1 }
   0x6   :  { %p370_p2 = pnand %p368_p1, %p365_p0 }
   0x8   :  { %373 = shalt.err (!%p370_p2)
}
   0x9   :  { %s374_s21 = scalar_lea.vmem %s29_s13, 2048  ;;  %p379_p4 = scmp.lt.s32.totalorder %s29_s13, %s29_s13 }
   0xa   :  { %p375_p3 = scmp.ne.s32.totalorder %s29_s13, %s374_s21  ;;  %p380_p5 = scmp.lt.s32.totalorder %s374_s21, %s374_s21 }
   0xc   :  { %p381_p6 = por %p380_p5, %p379_p4 }
   0xe   :  { %p382_p7 = pnand %p381_p6, %p375_p3 }
  0x10   :  { %385 = shalt.err (!%p382_p7)
}
  0x11   :  { %s459_s22 = smov 64   ;;  %s460_s23 = smov 4  }
  0x12   :  { %34 = dma.hbm_to_vmem [thread:$0]  %s541_s1, 2048, %s29_s13, [#allocation6], %s459_s22, %s459_s22, %s460_s23  }
  0x13   :  { %s461_s26 = smov [#allocation2]   ;;  %s386_s30 = scalar_lea.hbm %s540_s0, 256 }
  0x14   :  { %s16_s27 = sshll.u32 %s461_s26, 4  ;;  %p387_p8 = scmp.ne.s32.totalorder %s540_s0, %s386_s30  ;;  %s17_s27 = int_to_ptr.vmem [resolvable:$true] %s16_s27 }
  0x15   :  { %p390_p9 = scmp.lt.u32.totalorder %s386_s30, %s540_s0 }
  0x17   :  { %p392_p10 = pnand %p390_p9, %p387_p8 }
  0x19   :  { %395 = shalt.err (!%p392_p10)
}
  0x1a   :  { %s396_s8 = scalar_lea.vmem %s17_s27, 256  ;;  %p401_p12 = scmp.lt.s32.totalorder %s17_s27, %s17_s27 }
  0x1b   :  { %p397_p11 = scmp.ne.s32.totalorder %s17_s27, %s396_s8  ;;  %p402_p13 = scmp.lt.s32.totalorder %s396_s8, %s396_s8 }
  0x1d   :  { %p403_p0 = por %p402_p13, %p401_p12 }
  0x1f   :  { %p404_p1 = pnand %p403_p0, %p397_p11 }
  0x21   :  { %407 = shalt.err (!%p404_p1)
}
  0x22   :  { %s462_s1 = smov 128   ;;  %s463_s9 = smov 8  }
  0x23   :  { %22 = dma.hbm_to_vmem [thread:$0]  %s540_s0, 256, %s17_s27, [#allocation3], %s462_s1, %s462_s1, %s463_s9  }
  0x24   :  { %s464_s12 = smov [#allocation7]   ;;  %s408_s16 = scalar_lea.hbm %s542_s2, 16 }
  0x25   :  { %s41_s13 = sshll.u32 %s464_s12, 4  ;;  %p409_p2 = scmp.ne.s32.totalorder %s542_s2, %s408_s16  ;;  %s42_s13 = int_to_ptr.vmem [resolvable:$true] %s41_s13 }
  0x26   :  { %p412_p3 = scmp.lt.u32.totalorder %s408_s16, %s542_s2 }
  0x28   :  { %p414_p4 = pnand %p412_p3, %p409_p2 }
  0x2a   :  { %417 = shalt.err (!%p414_p4)
}
  0x2b   :  { %s418_s21 = scalar_lea.vmem %s42_s13, 16  ;;  %s422_s0 = scalar_lea.vmem %s42_s13, 32 }
  0x2c   :  { %p419_p5 = scmp.ne.s32.totalorder %s42_s13, %s418_s21  ;;  %p423_p6 = scmp.lt.s32.totalorder %s42_s13, %s42_s13 }
  0x2d   :  { %p424_p7 = scmp.lt.s32.totalorder %s422_s0, %s418_s21 }
  0x2f   :  { %p425_p8 = por %p424_p7, %p423_p6 }
  0x31   :  { %p426_p9 = pnand %p425_p8, %p419_p5 }
  0x33   :  { %429 = shalt.err (!%p426_p9)
}
  0x34   :  { %44 = dma.hbm_to_vmem [thread:$0]  %s542_s2, 16, %s42_s13, [#allocation6]  }
  0x35   :  { %452 = dma.done.wait [#allocation3], 256  }
  0x36   :  { %453 = vsyncadd [#allocation3], 4294967040 }
  0x37   :  { %454 = dma.done.wait [#allocation6], 2064  }
  0x38   :  { %455 = vsyncadd [#allocation6], 4294965232  ;;  %v337_v0 = vld [vmem:[#allocation5 + $0x40] sm:$0xff]   ;;  %v339_v2 = vld [vmem:[#allocation5 + $0x48] sm:$0xff]   ;;  %v91_v18 = vlaneseq  ;;  %s465_s2 = smov [#allocation8]  }
  0x39   :  { %v338_v1 = vld [vmem:[#allocation5] sm:$0xff]   ;;  %307 = vmatprep.subr.bf16.mxu0 %v337_v0  ;;  %v340_v3 = vld [vmem:[#allocation5 + $0x8] sm:$0xff]   ;;  %v341_v4 = vld [vmem:[#allocation5 + $0x50] sm:$0xff]   ;;  %s267_s26 = sshll.u32 %s465_s2, 4  ;;  %s268_s26 = int_to_ptr.vmem [resolvable:$true] %s267_s26 }
  0x3a   :  { %308 = vmatpush3.bf16.msra.mxu0 %v338_v1  ;;  %v342_v5 = vld [vmem:[#allocation5 + $0x10] sm:$0xff]   ;;  %v343_v6 = vld [vmem:[#allocation5 + $0x58] sm:$0xff]   ;;  %v345_v8 = vld [vmem:[#allocation5 + $0x60] sm:$0xff]   ;;  %v92_v19 = vshrl.u32 %v91_v18, 7  ;;  %s430_s27 = scalar_lea.vmem %s268_s26, 128  ;;  %p435_p11 = scmp.lt.s32.totalorder %s268_s26, %s268_s26 }
  0x3b   :  { %309 = vmatprep.subr.bf16.mxu0 %v339_v2  ;;  %v344_v7 = vld [vmem:[#allocation5 + $0x18] sm:$0xff]   ;;  %v346_v9 = vld [vmem:[#allocation5 + $0x20] sm:$0xff]   ;;  %v347_v10 = vld [vmem:[#allocation5 + $0x68] sm:$0xff]   ;;  %p431_p10 = scmp.ne.s32.totalorder %s268_s26, %s430_s27  ;;  %p436_p12 = scmp.lt.s32.totalorder %s430_s27, %s430_s27 }
  0x3c   :  { %v355_v11 = vld [vmem:[#allocation2 + $0x4] ss:$8 sps:$4 sm:$0xff]   ;;  %v348_v12 = vld [vmem:[#allocation5 + $0x28] sm:$0xff]   ;;  %v353_v17 = vld [vmem:[#allocation2] ss:$8 sps:$4 sm:$0xff]   ;;  %v93_v22 = vsub.s32 0, %v92_v19 }
  0x3d   :  { %233 = vmatprep.mubr.bf16.mxu0 %v355_v11  ;;  %v349_v13 = vld [vmem:[#allocation5 + $0x70] sm:$0xff]   ;;  %v351_v15 = vld [vmem:[#allocation5 + $0x78] sm:$0xff]   ;;  %v89_v20 = vld [vmem:[#allocation7] sm:$0x1]  ;;  %p437_p13 = por %p436_p12, %p435_p11 }
  0x3e   :  { %310 = vmatpush3.bf16.msra.mxu0 %v340_v3  ;;  %v350_v14 = vld [vmem:[#allocation5 + $0x30] sm:$0xff]   ;;  %v352_v16 = vld [vmem:[#allocation5 + $0x38] sm:$0xff]   ;;  %v90_v21 = vunpack.c.l.bf16 %v89_v20 }
  0x3f   :  { %311 = vmatprep.subr.bf16.mxu0 %v341_v4  ;;  %p438_p0 = pnand %p437_p13, %p431_p10 }
  0x40   :  { %v94_v24 = vrot.slane %v90_v21, %v93_v22 }
  0x42   :  { %312 = vmatpush3.bf16.msra.mxu0 %v342_v5 }
  0x43   :  { %313 = vmatprep.subr.bf16.mxu0 %v343_v6 }
  0x46   :  { %314 = vmatpush3.bf16.msra.mxu0 %v344_v7 }
  0x47   :  { %315 = vmatprep.subr.bf16.mxu0 %v345_v8 }
  0x4a   :  { %316 = vmatpush3.bf16.msra.mxu0 %v346_v9 }
  0x4b   :  { %317 = vmatprep.subr.bf16.mxu0 %v347_v10 }
  0x4e   :  { %318 = vmatpush3.bf16.msra.mxu0 %v348_v12 }
  0x4f   :  { %319 = vmatprep.subr.bf16.mxu0 %v349_v13 }
  0x52   :  { %320 = vmatpush3.bf16.msra.mxu0 %v350_v14 }
  0x53   :  { %321 = vmatprep.subr.bf16.mxu0 %v351_v15 }
  0x56   :  { %322 = vmatpush3.bf16.msra.mxu0 %v352_v16 }
  0x59   :  { %234 = vmatmul.mubr.bf16.vlgmr.msra.gmra.mrb[0].mxu0 %v353_v17 }
 0x12c   :  { %v323_v23 = vpop.f32.mrb[0].mxu0 }
 0x12d   :  { %v324_v25 = vpop.f32.mrb[1].mxu0 }
 0x12e   :  { %v325_v26 = vadd.f32 %v324_v25, %v323_v23  ;;  %v326_v27 = vpop.f32.mrb[2].mxu0 }
 0x12f   :  { %v327_v28 = vpop.f32.mrb[3].mxu0 }
 0x130   :  { %v236_v29 = vadd.f32 %v325_v26, %v94_v24  ;;  %v328_v30 = vadd.f32 %v327_v28, %v326_v27 }
 0x132   :  { %v242_v31 = vsub.f32 0.0, %v236_v29  ;;  %v239_v32 = vadd.f32 %v328_v30, %v94_v24 }
 0x134   :  { %v244_v33 = vmul.f32 1.442695, %v242_v31  ;;  %v243_v34 = vsub.f32 0.0, %v239_v32 }
 0x136   :  { %356 = vpow2.f32 %v244_v33  ;;  %v246_v35 = vmul.f32 1.442695, %v243_v34 }
 0x138   :  { %358 = vpow2.f32 %v246_v35 }
 0x140   :  { %v357_v36 = vpop.eup %356 }
 0x141   :  { %v248_v37 = vadd.f32 1.0, %v357_v36 }
 0x142   :  { %v359_v38 = vpop.eup %358 }
 0x143   :  { %v249_v39 = vadd.f32 1.0, %v359_v38  ;;  %360 = vrcp.f32 %v248_v37 }
 0x145   :  { %362 = vrcp.f32 %v249_v39 }
 0x14d   :  { %v361_v40 = vpop.eup %360 }
 0x14f   :  { %v363_v41 = vpop.eup %362 }
 0x150   :  { %v305_v42 = vpack.c.bf16 %v363_v41, %v361_v40 }
 0x152   :  { %306 = vst [vmem:[#allocation8] sm:$0xff] %v305_v42  }
 0x153   :  { %441 = shalt.err (!%p438_p0)
}
 0x154   :  { %s442_s30 = scalar_lea.hbm %s543_s3, 128 }
 0x155   :  { %p443_p1 = scmp.ne.s32.totalorder %s543_s3, %s442_s30  ;;  %p446_p2 = scmp.lt.u32.totalorder %s442_s30, %s543_s3 }
 0x157   :  { %p448_p3 = pnand %p446_p2, %p443_p1 }
 0x159   :  { %451 = shalt.err (!%p448_p3)
}
 0x15a   :  { %273 = dma.vmem_to_hbm [thread:$0]  %s268_s26, 128, %s543_s3, [#allocation4], %s459_s22, %s459_s22, %s460_s23  }
 0x15b   :  { %456 = dma.done.wait [#allocation4], 128  }
 0x15c   :  { %457 = vsyncadd [#allocation4], 4294967168 }
 0x15d   :  { %277 = vsyncpa [#allocation3], 1 }
 0x15e   :  { %278 = vsyncpa [#allocation6], 1 }
 0x15f   :  { %279 = vsyncpa [#allocation4], 1 }

</bundles_post_ra>
